<compile_context>
chip_gen: v5e
topology: v5e:2x2
jax: 0.10.0
libtpu: 0.0.40
codegen_flags: <defaults>
</compile_context>

<pallas_src>
import jax
import jax.numpy as jnp
import numpy as np
from jax.experimental import pallas as pl
from jax.experimental.pallas import tpu as pltpu


def _scan_kernel(x_ref, a_ref, c_ref, o_ref, carry_ref):
    # x_ref / o_ref : (TM, TN, HWB) tiles
    # a_ref         : (TN, TN) lower-triangular scan matrix (f32)
    # c_ref         : (TN, 1) carry coefficients (f32)
    # carry_ref     : (TM, HWB) f32 running output of the previous N-block
    nb = pl.program_id(2)                       # N-block index (innermost axis)

    xf = x_ref[...].astype(jnp.float32)         # (TM, TN, HWB)
    tm, tn, _ = xf.shape

    # Incoming carry.  On the first N block substituting prev := x[:, 0]
    # makes the closed form below give y[0] = x[0] exactly, so no special
    # case and no uninitialized-scratch hazard (where = elementwise select).
    prev = jnp.where(nb == 0, xf[:, 0, :], carry_ref[...])       # (TM, HWB)

    # y[m, j, d] = sum_{i<=j} w*(1-w)^(j-i) * x[m, i, d]   (MXU, batched)
    a = jnp.broadcast_to(a_ref[...][None], (tm, tn, tn))
    y = jax.lax.dot_general(
        a, xf,
        dimension_numbers=(((2,), (1,)), ((0,), (0,))),
        preferred_element_type=jnp.float32)                      # (TM, TN, HWB)
    #            + (1-w)^(j+1) * prev[m, d]                       (carry term)
    y = y + c_ref[...][None, :, :] * prev[:, None, :]

    o_ref[...] = y.astype(o_ref.dtype)          # one dense, lane-aligned store
    carry_ref[...] = y[:, tn - 1, :]            # carry for the next N-block


def _scan_coefficients(w, tn):
    """Lower-triangular scan matrix A (tn, tn) and carry vector c (tn, 1)."""
    wf = jnp.asarray(w, jnp.float32)
    omw = jnp.float32(1.0) - wf
    # Exact sequential powers of (1-w) via cumprod (matches recursion rounding).
    p = jnp.concatenate(
        [jnp.ones((1,), jnp.float32),
         jnp.cumprod(jnp.full((tn - 1,), omw, jnp.float32))])     # p[k] = omw^k
    idx = jnp.arange(tn)
    diff = idx[:, None] - idx[None, :]
    scan_mat = jnp.where(diff >= 0, wf * p[jnp.clip(diff, 0, tn - 1)],
                         jnp.float32(0.0)).astype(jnp.float32)     # (tn, tn)
    carry_vec = (omw * p).astype(jnp.float32).reshape(tn, 1)       # (tn, 1)
    return scan_mat, carry_vec


def recursive_filter(x, w=0.2):
    """x: (B, C, N, H, W) float array. Returns same-shape filtered output."""
    B, C, N, H, W = x.shape
    if N == 1:                                   # y[:, :, 0] = x[:, :, 0]
        return x

    M, HW = B * C, H * W
    itemsize = jnp.dtype(x.dtype).itemsize
    min_sub = {4: 8, 2: 16, 1: 32}.get(itemsize, 8)

    # Lane dim: pad H*W up to a multiple of 128 (full-lane vregs / DMAs).
    HW_pad = pl.cdiv(HW, 128) * 128

    # Recursion-axis tile: whole N when small, else a sublane-aligned chunk;
    # pad N with zero frames so the N grid divides exactly (safe: y[j] never
    # depends on x[i > j]; padded outputs are sliced off).
    if N < min_sub:
        tn, N_pad = min_sub, min_sub
    elif N <= 4 * min_sub:
        tn, N_pad = N, N
    else:
        tn = 4 * min_sub
        N_pad = pl.cdiv(N, tn) * tn

    xr = x.reshape(M, N, HW)
    if HW_pad != HW or N_pad != N:
        xr = jnp.pad(xr, ((0, 0), (0, N_pad - N), (0, HW_pad - HW)))

    # ---- generation-aware block sizing --------------------------------------
    try:
        vmem_cap = int(pltpu.get_tpu_info().vmem_capacity_bytes)
    except Exception:
        vmem_cap = 64 * 1024 * 1024              # conservative fallback
    if vmem_cap <= 80 * 1024 * 1024:             # v7x: 64 MiB VMEM per TC
        block_budget = 3 * 1024 * 1024
        vmem_limit = 32 * 1024 * 1024
    else:                                        # v5e / v6e: 128 MiB VMEM
        block_budget = 4 * 1024 * 1024
        vmem_limit = 64 * 1024 * 1024

    # Lane-axis block (split HW only if one M-row per N-block exceeds budget).
    if HW_pad * tn * itemsize <= block_budget:
        hw_blk = HW_pad
    else:
        hw_blk = max(128, ((block_budget // (tn * itemsize)) // 128) * 128)
        hw_blk = min(hw_blk, HW_pad)
    grid_hw = pl.cdiv(HW_pad, hw_blk)

    # M tile: fill the block budget, but bound intermediates / batched-matmul
    # unroll, and guarantee multiple parallel tiles (v7x megacore, pipelining).
    row_bytes = tn * hw_blk * itemsize
    tm = max(1, min(M, block_budget // max(1, row_bytes)))
    tm = min(tm, 256)
    if M >= 2 and grid_hw == 1:
        min_rows = max(1, (256 * 1024) // row_bytes)   # keep blocks >= 256 KiB
        target_tiles = 8 if M >= 8 else 2
        tm = min(tm, max(min_rows, pl.cdiv(M, target_tiles)))
        tm = min(tm, pl.cdiv(M, 2))                    # always >= 2 M tiles
    tm = max(1, tm)

    grid = (pl.cdiv(M, tm), grid_hw, N_pad // tn)

    scan_mat, carry_vec = _scan_coefficients(w, tn)

    out = pl.pallas_call(
        _scan_kernel,
        out_shape=jax.ShapeDtypeStruct((M, N_pad, HW_pad), x.dtype),
        grid_spec=pltpu.PrefetchScalarGridSpec(
            num_scalar_prefetch=0,
            grid=grid,
            in_specs=[
                pl.BlockSpec((tm, tn, hw_blk), lambda m, h, n: (m, n, h)),
                pl.BlockSpec((tn, tn), lambda m, h, n: (0, 0)),
                pl.BlockSpec((tn, 1), lambda m, h, n: (0, 0)),
            ],
            out_specs=pl.BlockSpec((tm, tn, hw_blk), lambda m, h, n: (m, n, h)),
            scratch_shapes=[pltpu.VMEM((tm, hw_blk), jnp.float32)],
        ),
        compiler_params=pltpu.CompilerParams(
            # M and HW tiles independent -> parallel (megacore on v7x);
            # N blocks carry the recursion -> sequential ("arbitrary").
            dimension_semantics=("parallel", "parallel", "arbitrary"),
            vmem_limit_bytes=vmem_limit,
        ),
        cost_estimate=pl.CostEstimate(
            flops=2 * M * N_pad * HW_pad,
            transcendentals=0,
            bytes_accessed=2 * M * N_pad * HW_pad * itemsize,
        ),
    )(xr, scan_mat, carry_vec)

    if HW_pad != HW or N_pad != N:
        out = out[:, :N, :HW]
    return out.reshape(B, C, N, H, W)


def _reference(x, w=0.2):
    # Pure-JAX reference replicating the PyTorch loop.
    B, C, N, H, W = x.shape
    outs = [x[:, :, 0]]
    for i in range(1, N):
        outs.append(w * x[:, :, i] + (1.0 - w) * outs[-1])
    return jnp.stack(outs, axis=2)


if __name__ == "__main__":
    key = jax.random.PRNGKey(0)
    B, C, N, H, W = 2, 4, 8, 16, 16
    x = jax.random.normal(key, (B, C, N, H, W), dtype=jnp.float32)

    y = recursive_filter(x, w=0.2)
    y = jax.block_until_ready(y)

    y_ref = _reference(x, w=0.2)
    np.testing.assert_allclose(np.asarray(y), np.asarray(y_ref),
                               rtol=1e-5, atol=1e-5)

    print("KERNEL_OK")
</pallas_src>

<mosaic_0001>
module attributes {stable_mosaic.version = 11 : i64} {
  func.func @_scan_kernel(%arg0: i32, %arg1: i32, %arg2: i32, %arg3: memref<4x8x256xf32, #tpu.memory_space<vmem>>, %arg4: memref<8x8xf32, #tpu.memory_space<vmem>>, %arg5: memref<8x1xf32, #tpu.memory_space<vmem>>, %arg6: memref<4x8x256xf32, #tpu.memory_space<vmem>>, %arg7: memref<4x256xf32, #tpu.memory_space<vmem>>) attributes {dimension_semantics = [#tpu.dimension_semantics<parallel>, #tpu.dimension_semantics<parallel>, #tpu.dimension_semantics<arbitrary>], iteration_bounds = array<i64: 2, 1, 1>, scalar_prefetch = 0 : i64, scratch_operands = 1 : i64, tpu.core_type = #tpu.core_type<tc>, window_params = [{transform_indices = @transform_0, window_bounds = array<i64: 4, 8, 256>}, {pipeline_mode = #tpu.pipeline_mode<synchronous>, transform_indices = @transform_1, window_bounds = array<i64: 8, 8>}, {pipeline_mode = #tpu.pipeline_mode<synchronous>, transform_indices = @transform_2, window_bounds = array<i64: 8, 1>}, {transform_indices = @transform_3, window_bounds = array<i64: 4, 8, 256>}]} {
    %c0 = arith.constant 0 : index
    %c0_0 = arith.constant 0 : index
    %c0_1 = arith.constant 0 : index
    %0 = vector.load %arg3[%c0, %c0_0, %c0_1] : memref<4x8x256xf32, #tpu.memory_space<vmem>>, vector<4x8x256xf32>
    %c0_i32 = arith.constant 0 : i32
    %1 = arith.cmpi eq, %arg2, %c0_i32 : i32
    %2 = vector.extract_strided_slice %0 {offsets = [0, 0, 0], sizes = [4, 1, 256], strides = [1, 1, 1]} : vector<4x8x256xf32> to vector<4x1x256xf32>
    %3 = vector.shape_cast %2 : vector<4x1x256xf32> to vector<4x256xf32>
    %c0_2 = arith.constant 0 : index
    %c0_3 = arith.constant 0 : index
    %4 = vector.load %arg7[%c0_2, %c0_3] : memref<4x256xf32, #tpu.memory_space<vmem>>, vector<4x256xf32>
    %5 = arith.select %1, %3, %4 : vector<4x256xf32>
    %c0_4 = arith.constant 0 : index
    %c0_5 = arith.constant 0 : index
    %6 = vector.load %arg4[%c0_4, %c0_5] : memref<8x8xf32, #tpu.memory_space<vmem>>, vector<8x8xf32>
    %7 = vector.shape_cast %6 : vector<8x8xf32> to vector<1x8x8xf32>
    %8 = vector.shape_cast %7 : vector<1x8x8xf32> to vector<1x8x8xf32>
    %9 = vector.broadcast %8 : vector<1x8x8xf32> to vector<4x8x8xf32>
    %cst = arith.constant dense<0.000000e+00> : vector<4x8x256xf32>
    %10 = tpu.matmul %9, %0, %cst {dimension_numbers = #tpu.dot_dimension_numbers<[2], [1], [1], [2], [0, 0, 0, 1, 1, 2], [0], [0]>} : vector<4x8x8xf32>, vector<4x8x256xf32>, vector<4x8x256xf32> -> vector<4x8x256xf32>
    %c0_6 = arith.constant 0 : index
    %c0_7 = arith.constant 0 : index
    %11 = vector.load %arg5[%c0_6, %c0_7] : memref<8x1xf32, #tpu.memory_space<vmem>>, vector<8x1xf32>
    %12 = vector.shape_cast %11 : vector<8x1xf32> to vector<1x8x1xf32>
    %13 = vector.shape_cast %5 : vector<4x256xf32> to vector<4x1x256xf32>
    %14 = vector.broadcast %12 : vector<1x8x1xf32> to vector<4x8x256xf32>
    %15 = vector.broadcast %13 : vector<4x1x256xf32> to vector<4x8x256xf32>
    %16 = arith.mulf %14, %15 : vector<4x8x256xf32>
    %17 = arith.addf %10, %16 : vector<4x8x256xf32>
    %c0_8 = arith.constant 0 : index
    %c0_9 = arith.constant 0 : index
    %c0_10 = arith.constant 0 : index
    %18 = vector.load %arg6[%c0_8, %c0_9, %c0_10] : memref<4x8x256xf32, #tpu.memory_space<vmem>>, vector<4x8x256xf32>
    tpu.vector_store %arg6[%c0_8, %c0_9, %c0_10], %17 {strides = array<i32>} : memref<4x8x256xf32, #tpu.memory_space<vmem>>, vector<4x8x256xf32>,
    %19 = vector.extract_strided_slice %17 {offsets = [0, 7, 0], sizes = [4, 1, 256], strides = [1, 1, 1]} : vector<4x8x256xf32> to vector<4x1x256xf32>
    %20 = vector.shape_cast %19 : vector<4x1x256xf32> to vector<4x256xf32>
    %c0_11 = arith.constant 0 : index
    %c0_12 = arith.constant 0 : index
    %21 = vector.load %arg7[%c0_11, %c0_12] : memref<4x256xf32, #tpu.memory_space<vmem>>, vector<4x256xf32>
    tpu.vector_store %arg7[%c0_11, %c0_12], %20 {strides = array<i32>} : memref<4x256xf32, #tpu.memory_space<vmem>>, vector<4x256xf32>,
    return
  }
  func.func @transform_0(%arg0: i32, %arg1: i32, %arg2: i32) -> (i32, i32, i32) {
    %c0_i32 = arith.constant 0 : i32
    return %arg0, %arg2, %arg1 : i32, i32, i32
  }
  func.func @transform_1(%arg0: i32, %arg1: i32, %arg2: i32) -> (i32, i32) {
    %c0_i32 = arith.constant 0 : i32
    %c0_i32_0 = arith.constant 0 : i32
    %c0_i32_1 = arith.constant 0 : i32
    return %c0_i32, %c0_i32_0 : i32, i32
  }
  func.func @transform_2(%arg0: i32, %arg1: i32, %arg2: i32) -> (i32, i32) {
    %c0_i32 = arith.constant 0 : i32
    %c0_i32_0 = arith.constant 0 : i32
    %c0_i32_1 = arith.constant 0 : i32
    return %c0_i32, %c0_i32_0 : i32, i32
  }
  func.func @transform_3(%arg0: i32, %arg1: i32, %arg2: i32) -> (i32, i32, i32) {
    %c0_i32 = arith.constant 0 : i32
    return %arg0, %arg2, %arg1 : i32, i32, i32
  }
}

</mosaic_0001>

<bundles_post_ra>
// kernel: tpu_custom_call.1
= control target key start
LH: loop header
LB: loop body
LE: loop exit
PB: predicated region body
PF: predicated region fallthrough
CT: control target
= control target key end

     0   :  { %8 = vsyncpa [#allocation4], 0  ;;  %s1011_s0 = inlined_call_operand.hbm [shape: f32[8,8,256], index: 0, kind: input, shape index: {}]   ;;  %s1012_s1 = inlined_call_operand.vmem [shape: f32[8,8], index: 1, kind: input, shape index: {}]   ;;  %s1013_s2 = inlined_call_operand.vmem [shape: f32[8,1], index: 2, kind: input, shape index: {}]   ;;  %s1014_s3 = inlined_call_operand.hbm [shape: f32[8,8,256], index: 3, kind: output, shape index: {}]  }
   0x1   :  { %10 = vsyncpa [#allocation4 + $0x1], 0 }
   0x2   :  { %11 = vsyncpa [#allocation5], 0 }
   0x3   :  { %13 = vsyncpa [#allocation5 + $0x1], 0  ;;  %s853_s12 = smov 0   ;;  %s855_s13 = smov 0  }
   0x4   :  { %s857_s14 = smov 0   ;;  %s859_s15 = smov 0  }
   0x5   :  { %s861_s16 = smov 0   ;;  %s863_s17 = smov 0  }
   0x6 LB: > { %s617_s18 = sadd.s32 4294967295, %s826_s17   ;;  %s618_s19 = sadd.s32 4294967294, %s826_s17   ;;  %s826_s17 = sphi %s863_s17, %s19_s17   ;;  %s822_s16 = sphi %s861_s16, %s1023_s16   ;;  %s818_s15 = sphi %s859_s15, %s1022_s15   ;;  %s814_s14 = sphi %s857_s14, %s1021_s14   ;;  %s810_s13 = sphi %s855_s13, %s1020_s13   ;;  %s806_s12 = sphi %s853_s12, %s1019_s12  }
   0x7   : > { %s38_s20 = sadd.s32 1, %s822_s16  ;;  %s49_s21 = sadd.s32 1, %s814_s14 }
   0x8   : > { %p40_p0 = scmp.ge.s32.totalorder %s38_s20, 2  ;;  %p56_p1 = scmp.ne.s32.totalorder %s814_s14, %s810_s13 }
   0x9   : > { %p57_p2 = scmp.eq.s32.totalorder %s826_s17, 0  ;;  %p62_p3 = scmp.ne.s32.totalorder %s810_s13, %s806_s12 }
   0xa   : > { %s1025_s20 = smov (%p40_p0, %s38_s20), 0  ;;  %p63_p5 = scmp.eq.s32.totalorder %s617_s18, 0 }
   0xb   : > { %p894_p4 = por %p57_p2, %p56_p1  ;;  %s42_s23 = ssub.s32 %s822_s16, %s1025_s20 }
   0xc   : > { %p132_p6 = scmp.eq.s32.totalorder %s617_s18, 1  ;;  %p47_p7 = scmp.eq.s32.totalorder %s42_s23, 0 }
   0xd   : > { %p900_p8 = por %p63_p5, %p62_p3  ;;  %p138_p10 = scmp.eq.s32.totalorder %s618_s19, 1 }
   0xe   : > { %p904_p9 = por %p132_p6, %p56_p1  ;;  %p620_p12 = scmp.ge.s32.totalorder %s826_s17, 2 }
   0xf   : > { %s909_s26 = scalar_select %p47_p7, %s814_s14, %s49_s21  }
  0x10   : > { %p911_p11 = por %p138_p10, %p62_p3  ;;  %p658_p13 = scmp.lt.s32.totalorder %s826_s17, 2 }
  0x11   : > { %s164_s28 = sand.u32 1, %s814_s14   ;;  %s643_s30 = sshll.u32 %s822_s16, 6 }
  0x12   : > { %s621_s29 = sshll.u32 %s164_s28, 6  ;;  %s178_s6 = scalar_lea.hbm %s1011_s0, %s643_s30 }
  0x13   : > { %s168_s7 = scalar_lea.vmem [#allocation3], %s621_s29  ;;  %s179_s9 = sshll.u32 %s178_s6, 4  ;;  %s180_s9 = int_to_ptr.hbm [resolvable:$true] %s179_s9 }
  0x14   : > { %s181_s8 = sshll.u32 %s168_s7, 4  ;;  %p651_p0 = pnand %p658_p13, %p894_p4  ;;  %s182_s8 = int_to_ptr.vmem [resolvable:$true] %s181_s8 }
  0x15   : > { %p625_p1 = scmp.ge.s32.totalorder %s826_s17, 1  ;;  %s165_s10 = scalar_lea.sflag [#allocation4], %s164_s28 }
  0x16   : > { %s828_s11 = smov 256   ;;  %s829_s18 = smov 16  }
  0x17   : > { %653 = dma.hbm_to_vmem [thread:$0]  (!%p651_p0), %s180_s9, 1024, %s182_s8, %s165_s10, %s828_s11, %s828_s11, %s829_s18  }
  0x18   : > { %p189_p2 = scmp.lt.s32.totalorder %s826_s17, 3 }
  0x1a   : > { %p190_p3 = pnand %p625_p1, %p189_p2 }
  0x1b   : > { %s927_s19 = sand.u32 (!%p190_p3), 1, %s810_s13  }
  0x1c   : > { %193 = sbr.rel (%p190_p3) target bundleno = 194 (0xc2), region = 32  ;;  %s626_s21 = sshll.u32 (!%p190_p3), %s927_s19, 6 }
  0x1d   : > { %s196_s23 = scalar_lea.sflag (!%p190_p3), [#allocation4], %s927_s19  ;;  %s199_s22 = scalar_lea.vmem (!%p190_p3), [#allocation3], %s626_s21 }
  0x21   : > { %797 = dma.done.wait (%p900_p8), %s196_s23, 1024  }
  0x22   : > { %799 = vsyncadd (%p900_p8), %s196_s23, 4294966272  ;;  %v830_v0 = vmov 0   ;;  %v227_v1 = vld [vmem:[%s199_s22] sm:$0xff]  ;;  %v228_v2 = vld [vmem:[%s199_s22 + $0x8] sm:$0xff]  ;;  %vm289_vm0 = vcmask 64512   ;;  %s953_s4 = scalar_lea.vmem [#allocation6], %s626_s21 }
  0x23   : > { %713 = vset.pattern.permute.xlu0 %v830_v0  ;;  %v229_v3 = vld [vmem:[%s199_s22 + $0x10] sm:$0xff]  ;;  %308 = vmatpush.msra.mxu0 %v227_v1  ;;  %v230_v4 = vld [vmem:[%s199_s22 + $0x18] sm:$0xff]  ;;  %v231_v8 = vld [vmem:[%s199_s22 + $0x20] sm:$0xff]  ;;  %v273_v11 = vperm.slane %v227_v1, 0  ;;  %v274_v12 = vperm.slane %v228_v2, 0  ;;  %s645_s5 = sshll.u32 %s818_s15, 6 }
  0x24   : > { %328 = vmatpush.msra.mxu1 %v228_v2  ;;  %v266_v5 = vld [vmem:[%s1012_s1] sm:$0xff]  ;;  %348 = vmatpush.msra.mxu2 %v229_v3  ;;  %v234_v7 = vld [vmem:[%s199_s22 + $0x38] sm:$0xff]  ;;  %v232_v9 = vld [vmem:[%s199_s22 + $0x28] sm:$0xff]  ;;  %v275_v16 = vperm.slane %v229_v3, 0  ;;  %v276_v17 = vperm.slane %v230_v4, 0  ;;  %v277_v22 = vperm.slane %v231_v8, 0  ;;  %s519_s8 = scalar_lea.hbm %s1014_s3, %s645_s5 }
  0x25   : > { %368 = vmatpush.msra.mxu3 %v230_v4  ;;  %v233_v6 = vld [vmem:[%s199_s22 + $0x30] sm:$0xff]  ;;  %628 = vmatmul.msk.f32.vlgmr.msra.gmra.mxu0 %vm289_vm0, %v266_v5  ;;  %v278_v23 = vperm.slane %v232_v9, 0  ;;  %v280_v35 = vperm.slane %v234_v7, 0  ;;  %s520_s9 = sshll.u32 %s953_s4, 4  ;;  %s522_s15 = sshll.u32 %s519_s8, 4  ;;  %vm487_vm1 = vcmask 1041409   ;;  %s965_s9 = int_to_ptr.vmem [resolvable:$true] %s520_s9  ;;  %s968_s15 = int_to_ptr.hbm [resolvable:$true] %s522_s15 }
  0x26   : > { %629 = vmatmul.msk.f32.vlgmr.msra.gmra.mxu1 %vm289_vm0, %v266_v5  ;;  %630 = vmatmul.msk.f32.vlgmr.msra.gmra.mxu2 %vm289_vm0, %v266_v5  ;;  %v267_v10 = vld [vmem:[%s1013_s2] sm:$0xff]  ;;  %v279_v34 = vperm.slane %v233_v6, 0  ;;  %vm489_vm2 = vcmask 1045509   ;;  %s503_s10 = scalar_lea.sflag [#allocation5], %s927_s19  ;;  %s758_s11 = sshra.s32 %s968_s15, 4  ;;  %s759_s11 = int_to_ptr.hbm [resolvable:$true] %s758_s11 }
  0x27   : > { %631 = vmatmul.msk.f32.vlgmr.msra.gmra.mxu3 %vm289_vm0, %v266_v5  ;;  %428 = vmatpush.msrb.mxu2 %v233_v6  ;;  %s760_s18 = scalar_lea.hbm %s759_s11, 64  ;;  %s764_s22 = scalar_lea.hbm %s1014_s3, 128 }
  0x28   : > { %448 = vmatpush.msrb.mxu3 %v234_v7  ;;  %388 = vmatpush.msrb.mxu0 %v231_v8  ;;  %p761_p4 = scmp.ne.s32.totalorder %s759_s11, %s760_s18  ;;  %p765_p7 = scmp.lt.s32.totalorder %s759_s11, %s1014_s3 }
  0x29   : > { %408 = vmatpush.msrb.mxu1 %v232_v9  ;;  %270 = vperm.xlu0 %713, %v267_v10   ;;  %p766_p8 = scmp.lt.s32.totalorder %s764_s22, %s760_s18 }
  0x2a   : > { %p762_p5 = pnand %p761_p4, %p904_p9 }
  0x2b   : > { %p767_p10 = por %p766_p8, %p765_p7 }
  0x2c   : > { %p763_p6 = pneg %p762_p5 }
  0x2d   : > { %632 = vmatmul.msk.f32.vlgmr.msrb.gmra.mxu0 %vm289_vm0, %v266_v5 }
  0x2e   : > { %633 = vmatmul.msk.f32.vlgmr.msrb.gmra.mxu1 %vm289_vm0, %v266_v5  ;;  %634 = vmatmul.msk.f32.vlgmr.msrb.gmra.mxu2 %vm289_vm0, %v266_v5  ;;  %p768_p13 = pnand %p767_p10, %p763_p6 }
  0x2f   : > { %635 = vmatmul.msk.f32.vlgmr.msrb.gmra.mxu3 %vm289_vm0, %v266_v5 }
  0x9b   : > { %v271_v13 = vpop.permute.xlu0 %270 }
  0x9c   : > { %v281_v14 = vmul.f32 %v273_v11, %v271_v13  ;;  %v282_v15 = vmul.f32 %v274_v12, %v271_v13  ;;  %v283_v24 = vmul.f32 %v275_v16, %v271_v13  ;;  %v284_v25 = vmul.f32 %v276_v17, %v271_v13 }
  0x9d   : > { %v285_v26 = vmul.f32 %v277_v22, %v271_v13  ;;  %v286_v32 = vmul.f32 %v278_v23, %v271_v13  ;;  %v287_v38 = vmul.f32 %v279_v34, %v271_v13  ;;  %v288_v39 = vmul.f32 %v280_v35, %v271_v13 }
  0xa2   : > { %v310_v18 = vpop.f32.mrf.mxu0 }
  0xa3   : > { %v330_v19 = vpop.f32.mrf.mxu1  ;;  %v311_v20 = vadd.f32 %v310_v18, %v281_v14 }
  0xa4   : > { %v331_v21 = vadd.f32 %v330_v19, %v282_v15 }
  0xa5   : > { %453 = vst [vmem:[%s953_s4] sm:$0xff] %v311_v20 }
  0xa6   : > { %469 = vst.sshfl [vmem:[#allocation1] sm:$0xff pattern:$0x75316420] %v311_v20 }
  0xa7   : > { %454 = vst [vmem:[%s953_s4 + $0x8] sm:$0xff] %v331_v21 }
  0xa8   : > { %470 = vst.sshfl [vmem:[#allocation1 + $0x8] sm:$0xff pattern:$0x75316420] %v331_v21 }
  0xa9   : > { %v350_v27 = vpop.f32.mrf.mxu2 }
  0xaa   : > { %v370_v28 = vpop.f32.mrf.mxu3  ;;  %v351_v29 = vadd.f32 %v350_v27, %v283_v24  ;;  %v390_v31 = vpop.f32.mrf.mxu0 }
  0xab   : > { %v371_v30 = vadd.f32 %v370_v28, %v284_v25  ;;  %v410_v33 = vpop.f32.mrf.mxu1  ;;  %v391_v36 = vadd.f32 %v390_v31, %v285_v26 }
  0xac   : > { %455 = vst [vmem:[%s953_s4 + $0x10] sm:$0xff] %v351_v29  ;;  %v411_v37 = vadd.f32 %v410_v33, %v286_v32 }
  0xad   : > { %473 = vst.sshfl [vmem:[#allocation1 + $0x10] sm:$0xff pattern:$0x75316420] %v351_v29 }
  0xae   : > { %456 = vst [vmem:[%s953_s4 + $0x18] sm:$0xff] %v371_v30 }
  0xaf   : > { %474 = vst.sshfl [vmem:[#allocation1 + $0x18] sm:$0xff pattern:$0x75316420] %v371_v30  ;;  %v472_v44 = vld [vmem:[#allocation1 + $0x1] ss:$2 sm:$0xff] }
  0xb0   : > { %457 = vst [vmem:[%s953_s4 + $0x20] sm:$0xff] %v391_v36  ;;  %v485_v46 = vrot.slane %v472_v44, 3 }
  0xb1   : > { %477 = vst.sshfl [vmem:[#allocation1 + $0x20] sm:$0xff pattern:$0x75316420] %v391_v36  ;;  %v430_v40 = vpop.f32.mrf.mxu2 }
  0xb2   : > { %v450_v41 = vpop.f32.mrf.mxu3  ;;  %458 = vst [vmem:[%s953_s4 + $0x28] sm:$0xff] %v411_v37  ;;  %v431_v42 = vadd.f32 %v430_v40, %v287_v38 }
  0xb3   : > { %v451_v43 = vadd.f32 %v450_v41, %v288_v39  ;;  %478 = vst.sshfl [vmem:[#allocation1 + $0x28] sm:$0xff pattern:$0x75316420] %v411_v37 }
  0xb4   : > { %459 = vst [vmem:[%s953_s4 + $0x30] sm:$0xff] %v431_v42 }
  0xb5   : > { %481 = vst.sshfl [vmem:[#allocation1 + $0x30] sm:$0xff pattern:$0x75316420] %v431_v42 }
  0xb6   : > { %v476_v45 = vld [vmem:[#allocation1 + $0x11] ss:$2 sm:$0xff]  ;;  %460 = vst [vmem:[%s953_s4 + $0x38] sm:$0xff] %v451_v43 }
  0xb7   : > { %v486_v47 = vrot.slane %v476_v45, 2  ;;  %482 = vst.sshfl [vmem:[#allocation1 + $0x38] sm:$0xff pattern:$0x75316420] %v451_v43 }
  0xb8   : > { %771 = shalt.err (!%p768_p13)
}
  0xb9   : > { %s831_s19 = smov 256   ;;  %s832_s24 = smov 16   ;;  %v488_v48 = vsel %vm487_vm1, %v486_v47, %v485_v46  ;;  %vm492_vm3 = vcmask 1042434   ;;  %vm494_vm4 = vcmask 1046534   ;;  %vm496_vm5 = vcmask 1043459  }
  0xba   : > { %648 = dma.vmem_to_hbm [thread:$0]  (%p904_p9), %s965_s9, 1024, %s968_s15, %s503_s10, %s831_s19, %s831_s19, %s832_s24   ;;  %v490_v49 = vsel %vm489_vm2, %v486_v47, %v488_v48  ;;  %v480_v50 = vld [vmem:[#allocation1 + $0x21] ss:$2 sm:$0xff]  ;;  %vm498_vm6 = vcmask 1047559  }
  0xbb   : > { %v491_v51 = vrot.slane %v480_v50, 1 }
  0xbd   : > { %v493_v52 = vsel %vm492_vm3, %v491_v51, %v490_v49 }
  0xbe   : > { %v484_v53 = vld [vmem:[#allocation1 + $0x31] ss:$2 sm:$0xff]  ;;  %v495_v54 = vsel %vm494_vm4, %v491_v51, %v493_v52 }
  0xbf   : > { %v497_v55 = vsel %vm496_vm5, %v484_v53, %v495_v54 }
  0xc0   : > { %v499_v56 = vsel %vm498_vm6, %v484_v53, %v497_v55 }
  0xc1   : > { %501 = vst [vmem:[#allocation2] sm:$0xff] %v499_v56 }
  0xc2 PF: > { %s537_s25 = sand.u32 1, %s806_s12   ;;  %p655_p9 = pnand %p620_p12, %p911_p11 }
  0xc3   : > { %s538_s30 = scalar_lea.sflag [#allocation5], %s537_s25 }
  0xc4   : > { %p656_p0 = pneg %p655_p9 }
  0xc6   : > { %801 = dma.done.wait (%p656_p0), %s538_s30, 1024  }
  0xc7   : > { %803 = vsyncadd (%p656_p0), %s538_s30, 4294966272  ;;  %s19_s17 = sadd.s32 1, %s826_s17   ;;  %s1019_s12 = smov %s810_s13 }
  0xc8   : > { %p16_p1 = scmp.ge.s32.totalorder %s19_s17, 4   ;;  %s1020_s13 = smov %s814_s14 }
  0xc9   : > { %s1021_s14 = smov %s909_s26  ;;  %s1022_s15 = smov %s822_s16 }
  0xca   : > { %s1023_s16 = smov %s1025_s20  ;;  %18 = sbr.rel (!%p16_p1) target bundleno = 6 (0x6), region = 81 }
  0xcf   :  { %544 = vsyncpa [#allocation4], 1 }
  0xd0   :  { %546 = vsyncpa [#allocation4 + $0x1], 1 }
  0xd1   :  { %547 = vsyncpa [#allocation5], 1 }
  0xd2   :  { %549 = vsyncpa [#allocation5 + $0x1], 1 }

</bundles_post_ra>
